<compile_context>
chip_gen: v7x
topology: tpu7x:2x2x1
jax: 0.10.0
libtpu: 0.0.40
codegen_flags: <defaults>
</compile_context>

<pallas_src>
import jax
import jax.numpy as jnp
from jax.experimental import pallas as pl
from jax.experimental.pallas import tpu as pltpu


def _round_up(x, m):
    return (x + m - 1) // m * m


def _hms_kl_kernel(y_pred_ref, y_true_ref, partial_ref):
    # y_pred_ref / y_true_ref: (C, TILE_B) — class on sublanes, batch on lanes.
    logits = y_pred_ref[...].astype(jnp.float32)
    target = y_true_ref[...].astype(jnp.float32)

    # log_softmax along the class axis (axis=0), numerically stable.
    m = jnp.max(logits, axis=0, keepdims=True)
    z = logits - m
    lse = jnp.log(jnp.sum(jnp.exp(z), axis=0, keepdims=True))
    log_p = z - lse

    # PyTorch KLDivLoss pointwise term: xlogy(t, t) - t * log_p.
    # Where target == 0 (including batch padding) the term is exactly 0.
    safe_t = jnp.where(target > 0, target, 1.0)
    t_log_t = jnp.where(target > 0, target * jnp.log(safe_t), 0.0)
    kl = t_log_t - target * log_p

    # Per-lane (per-batch-element) partial sums; lane-dense (1, TILE_B) store.
    partial_ref[...] = jnp.sum(kl, axis=0, keepdims=True)


def hms_loss(y_pred, y_true, loss_weight, *, max_tile_b=2048):
    """Pallas implementation of HMSLoss('ver_1').forward.

    Args:
      y_pred: (B, C) logits (f32 or bf16).
      y_true: (B, C) target probabilities (f32 or bf16).
      loss_weight: (1,) float buffer (== [1.0] for ver_1).
    Returns:
      (loss_dict, loss) mirroring the PyTorch module.
    """
    B, C = y_pred.shape

    # Lane-dense tiling over the batch.
    tile_b = min(max_tile_b, _round_up(B, 128))
    b_pad = _round_up(B, tile_b)
    num_tiles = b_pad // tile_b

    # Layout plumbing: class on sublanes, batch on the 128-lane axis.
    y_pred_t = jnp.transpose(y_pred)  # (C, B)
    y_true_t = jnp.transpose(y_true)  # (C, B)
    if b_pad != B:
        pad = ((0, 0), (0, b_pad - B))
        y_pred_t = jnp.pad(y_pred_t, pad)  # zeros -> finite log_softmax
        y_true_t = jnp.pad(y_true_t, pad)  # zeros -> zero KL contribution

    partials = pl.pallas_call(
        _hms_kl_kernel,
        out_shape=jax.ShapeDtypeStruct((1, b_pad), jnp.float32),
        grid_spec=pltpu.PrefetchScalarGridSpec(
            num_scalar_prefetch=0,
            grid=(num_tiles,),
            in_specs=[
                pl.BlockSpec((C, tile_b), lambda i: (0, i)),
                pl.BlockSpec((C, tile_b), lambda i: (0, i)),
            ],
            out_specs=pl.BlockSpec((1, tile_b), lambda i: (0, i)),
        ),
        compiler_params=pltpu.CompilerParams(
            # Batch tiles are independent -> v7x can split across both TCs.
            dimension_semantics=("parallel",),
            # Explicit, conservative limit: fits v5e/v6e (128 MiB) and
            # v7x (64 MiB physical); per-step footprint is only ~200 KiB.
            vmem_limit_bytes=32 * 1024 * 1024,
        ),
    )(y_pred_t, y_true_t)

    # Final reduction / scaling done once in JAX (a few hundred floats).
    w = loss_weight.astype(jnp.float32)
    loss = (jnp.sum(partials) / jnp.float32(B)) * w[0]

    loss_dict = {"KLDivLoss": loss, "loss": loss}
    return loss_dict, loss


if __name__ == "__main__":
    # Deterministic synthetic inputs (HMS task: 6 classes).
    B, C = 8, 6
    key = jax.random.PRNGKey(0)
    k1, k2 = jax.random.split(key)

    y_pred = jax.random.normal(k1, (B, C), dtype=jnp.float32)        # raw logits
    y_true = jax.nn.softmax(jax.random.normal(k2, (B, C)), axis=1)   # target probs
    loss_weight = jnp.array([1.0], dtype=jnp.float32)                # registered buffer

    loss_dict, loss = hms_loss(y_pred, y_true, loss_weight)
    jax.block_until_ready(loss)

    # Pure-JAX reference (KLDivLoss batchmean on log_softmax).
    log_p = jax.nn.log_softmax(y_pred, axis=1)
    ref = jnp.sum(
        jnp.where(
            y_true > 0,
            y_true * (jnp.log(jnp.where(y_true > 0, y_true, 1.0)) - log_p),
            -y_true * log_p,
        )
    ) / B
    assert jnp.allclose(loss, ref, atol=1e-5, rtol=1e-5), (loss, ref)
    assert jnp.allclose(loss_dict["KLDivLoss"], loss_dict["loss"])

    print("KERNEL_OK")
</pallas_src>

<mosaic_0001>
module attributes {stable_mosaic.version = 11 : i64} {
  func.func @_hms_kl_kernel(%arg0: i32, %arg1: memref<6x128xf32, #tpu.memory_space<vmem>>, %arg2: memref<6x128xf32, #tpu.memory_space<vmem>>, %arg3: memref<1x128xf32, #tpu.memory_space<vmem>>) attributes {dimension_semantics = [#tpu.dimension_semantics<parallel>], iteration_bounds = array<i64: 1>, scalar_prefetch = 0 : i64, scratch_operands = 0 : i64, tpu.core_type = #tpu.core_type<tc>, window_params = [{transform_indices = @transform_0, window_bounds = array<i64: 6, 128>}, {transform_indices = @transform_1, window_bounds = array<i64: 6, 128>}, {transform_indices = @transform_2, window_bounds = array<i64: 1, 128>}]} {
    %c0 = arith.constant 0 : index
    %c0_0 = arith.constant 0 : index
    %0 = vector.load %arg1[%c0, %c0_0] : memref<6x128xf32, #tpu.memory_space<vmem>>, vector<6x128xf32>
    %c0_1 = arith.constant 0 : index
    %c0_2 = arith.constant 0 : index
    %1 = vector.load %arg2[%c0_1, %c0_2] : memref<6x128xf32, #tpu.memory_space<vmem>>, vector<6x128xf32>
    %cst = arith.constant dense<0xFF800000> : vector<128xf32>
    %2 = vector.multi_reduction <maximumf>, %0, %cst [0] : vector<6x128xf32> to vector<128xf32>
    %3 = vector.shape_cast %2 : vector<128xf32> to vector<1x128xf32>
    %4 = vector.broadcast %3 : vector<1x128xf32> to vector<6x128xf32>
    %5 = arith.subf %0, %4 : vector<6x128xf32>
    %6 = math.exp %5 : vector<6x128xf32>
    %cst_3 = arith.constant dense<0.000000e+00> : vector<128xf32>
    %7 = vector.multi_reduction <add>, %6, %cst_3 [0] : vector<6x128xf32> to vector<128xf32>
    %8 = vector.shape_cast %7 : vector<128xf32> to vector<1x128xf32>
    %9 = math.log %8 : vector<1x128xf32>
    %10 = vector.broadcast %9 : vector<1x128xf32> to vector<6x128xf32>
    %11 = arith.subf %5, %10 : vector<6x128xf32>
    %cst_4 = arith.constant 0.000000e+00 : f32
    %12 = vector.broadcast %cst_4 : f32 to vector<6x128xf32>
    %13 = arith.cmpf ogt, %1, %12 : vector<6x128xf32>
    %cst_5 = arith.constant 1.000000e+00 : f32
    %14 = vector.broadcast %cst_5 : f32 to vector<6x128xf32>
    %15 = arith.select %13, %1, %14 : vector<6x128xi1>, vector<6x128xf32>
    %cst_6 = arith.constant 0.000000e+00 : f32
    %16 = vector.broadcast %cst_6 : f32 to vector<6x128xf32>
    %17 = arith.cmpf ogt, %1, %16 : vector<6x128xf32>
    %18 = math.log %15 : vector<6x128xf32>
    %19 = arith.mulf %1, %18 : vector<6x128xf32>
    %cst_7 = arith.constant 0.000000e+00 : f32
    %20 = vector.broadcast %cst_7 : f32 to vector<6x128xf32>
    %21 = arith.select %17, %19, %20 : vector<6x128xi1>, vector<6x128xf32>
    %22 = arith.mulf %1, %11 : vector<6x128xf32>
    %23 = arith.subf %21, %22 : vector<6x128xf32>
    %cst_8 = arith.constant dense<0.000000e+00> : vector<128xf32>
    %24 = vector.multi_reduction <add>, %23, %cst_8 [0] : vector<6x128xf32> to vector<128xf32>
    %25 = vector.shape_cast %24 : vector<128xf32> to vector<1x128xf32>
    %c0_9 = arith.constant 0 : index
    %c0_10 = arith.constant 0 : index
    %26 = vector.load %arg3[%c0_9, %c0_10] : memref<1x128xf32, #tpu.memory_space<vmem>>, vector<1x128xf32>
    tpu.vector_store %arg3[%c0_9, %c0_10], %25 {strides = array<i32>} : memref<1x128xf32, #tpu.memory_space<vmem>>, vector<1x128xf32>,
    return
  }
  func.func @transform_0(%arg0: i32) -> (i32, i32) {
    %c0_i32 = arith.constant 0 : i32
    %c0_i32_0 = arith.constant 0 : i32
    return %c0_i32, %arg0 : i32, i32
  }
  func.func @transform_1(%arg0: i32) -> (i32, i32) {
    %c0_i32 = arith.constant 0 : i32
    %c0_i32_0 = arith.constant 0 : i32
    return %c0_i32, %arg0 : i32, i32
  }
  func.func @transform_2(%arg0: i32) -> (i32, i32) {
    %c0_i32 = arith.constant 0 : i32
    %c0_i32_0 = arith.constant 0 : i32
    return %c0_i32, %arg0 : i32, i32
  }
}

</mosaic_0001>

<bundles_post_ra>
// kernel: tpu_custom_call.1
= control target key start
LH: loop header
LB: loop body
LE: loop exit
PB: predicated region body
PF: predicated region fallthrough
CT: control target
= control target key end

     0   :  { %7 = vsyncpa [#allocation3], 0  ;;  %s231_s0 = inlined_call_operand.hbm [shape: f32[6,128], index: 0, kind: input, shape index: {}]   ;;  %s232_s1 = inlined_call_operand.hbm [shape: f32[6,128], index: 1, kind: input, shape index: {}]   ;;  %s233_s2 = inlined_call_operand.hbm [shape: f32[1,128], index: 2, kind: output, shape index: {}]  }
   0x1   :  { %8 = vsyncpa [#allocation6], 0 }
   0x2   :  { %9 = vsyncpa [#allocation4], 0  ;;  %s172_s9 = smov [#allocation2]   ;;  %s173_s11 = smov [#allocation5]  }
   0x3   :  { %s16_s10 = sshll.u32 %s172_s9, 4  ;;  %s26_s12 = sshll.u32 %s173_s11, 4  ;;  %s17_s10 = int_to_ptr.vmem [resolvable:$true] %s16_s10  ;;  %s27_s12 = int_to_ptr.vmem [resolvable:$true] %s26_s12 }
   0x4   :  { %s100_s15 = scalar_lea.hbm %s231_s0, 128 }
   0x5   :  { %p101_p0 = scmp.ne.s32.totalorder %s231_s0, %s100_s15  ;;  %p104_p1 = scmp.lt.u32.totalorder %s100_s15, %s231_s0 }
   0x7   :  { %p106_p2 = pnand %p104_p1, %p101_p0 }
   0x9   :  { %109 = shalt.err (!%p106_p2)
}
   0xa   :  { %s110_s20 = scalar_lea.vmem %s17_s10, 128  ;;  %p115_p4 = scmp.lt.s32.totalorder %s17_s10, %s17_s10 }
   0xb   :  { %p111_p3 = scmp.ne.s32.totalorder %s17_s10, %s110_s20  ;;  %p116_p5 = scmp.lt.s32.totalorder %s110_s20, %s110_s20 }
   0xd   :  { %p117_p6 = por %p116_p5, %p115_p4 }
   0xf   :  { %p118_p7 = pnand %p117_p6, %p111_p3 }
  0x11   :  { %121 = shalt.err (!%p118_p7)
}
  0x12   :  { %19 = dma.hbm_to_vmem [thread:$0]  %s231_s0, 128, %s17_s10, [#allocation3]  }
  0x13   :  { %s122_s25 = scalar_lea.hbm %s232_s1, 128 }
  0x14   :  { %p123_p8 = scmp.ne.s32.totalorder %s232_s1, %s122_s25  ;;  %p126_p9 = scmp.lt.u32.totalorder %s122_s25, %s232_s1 }
  0x16   :  { %p128_p10 = pnand %p126_p9, %p123_p8 }
  0x18   :  { %131 = shalt.err (!%p128_p10)
}
  0x19   :  { %s132_s30 = scalar_lea.vmem %s27_s12, 128  ;;  %p137_p12 = scmp.lt.s32.totalorder %s27_s12, %s27_s12 }
  0x1a   :  { %p133_p11 = scmp.ne.s32.totalorder %s27_s12, %s132_s30  ;;  %p138_p13 = scmp.lt.s32.totalorder %s132_s30, %s132_s30 }
  0x1c   :  { %p139_p0 = por %p138_p13, %p137_p12 }
  0x1e   :  { %p140_p1 = pnand %p139_p0, %p133_p11 }
  0x20   :  { %143 = shalt.err (!%p140_p1)
}
  0x21   :  { %29 = dma.hbm_to_vmem [thread:$0]  %s232_s1, 128, %s27_s12, [#allocation6]  }
  0x22   :  { %166 = dma.done.wait [#allocation3], 128  }
  0x23   :  { %167 = vsyncadd [#allocation3], 4294967168 }
  0x24   :  { %168 = dma.done.wait [#allocation6], 128  }
  0x25   :  { %169 = vsyncadd [#allocation6], 4294967168  ;;  %vm38_vm0 = vcmask 1045504   ;;  %v36_v0 = vld [vmem:[#allocation2] sm:$0x3f]  ;;  %s174_s1 = smov [#allocation7]  }
  0x26   :  { %v39_v1 = vsel %vm38_vm0, %v36_v0, -inf  ;;  %v37_v10 = vld [vmem:[#allocation5] sm:$0x3f]  ;;  %s81_s4 = sshll.u32 %s174_s1, 4  ;;  %s82_s4 = int_to_ptr.vmem [resolvable:$true] %s81_s4 }
  0x27   :  { %v40_v2 = vrot.slane %v39_v1, 4  ;;  %vm59_vm1 = vcmp.gt.f32.partialorder %v37_v10, 0.0  ;;  %s144_s5 = scalar_lea.vmem %s82_s4, 16  ;;  %s148_s6 = scalar_lea.vmem %s82_s4, 32 }
  0x28   :  { %v60_v15 = vsel %vm59_vm1, %v37_v10, 1.0  ;;  %p145_p2 = scmp.ne.s32.totalorder %s82_s4, %s144_s5  ;;  %p149_p3 = scmp.lt.s32.totalorder %s82_s4, %s82_s4 }
  0x29   :  { %v41_v3 = vmax.f32 %v39_v1, %v40_v2  ;;  %p150_p4 = scmp.lt.s32.totalorder %s148_s6, %s144_s5 }
  0x2b   :  { %v42_v4 = vrot.slane %v41_v3, 2  ;;  %p151_p5 = por %p150_p4, %p149_p3 }
  0x2d   :  { %v43_v5 = vmax.f32 %v41_v3, %v42_v4  ;;  %p152_p6 = pnand %p151_p5, %p145_p2 }
  0x2f   :  { %v44_v6 = vrot.slane %v43_v5, 1 }
  0x31   :  { %v45_v7 = vmax.f32 %v43_v5, %v44_v6 }
  0x33   :  { %v46_v8 = vsub.f32 %v36_v0, %v45_v7 }
  0x35   :  { %v47_v9 = vmul.f32 1.442695, %v46_v8 }
  0x37   :  { %94 = vpow2.f32 %v47_v9 }
  0x38   :  { %96 = vlog2.f32 %v60_v15 }
  0x41   :  { %v95_v11 = vpop.eup %94 }
  0x42   :  { %v49_v12 = vsel %vm38_vm0, %v95_v11, 0.0  ;;  %v97_v20 = vpop.eup %96 }
  0x43   :  { %v50_v13 = vrot.slane %v49_v12, 4  ;;  %v62_v21 = vmul.f32 0.6931472, %v97_v20 }
  0x45   :  { %v51_v14 = vadd.f32 %v50_v13, %v49_v12  ;;  %v63_v23 = vmul.f32 %v62_v21, %v37_v10 }
  0x47   :  { %v52_v16 = vrot.slane %v51_v14, 2  ;;  %v64_v26 = vsel %vm59_vm1, %v63_v23, 0.0 }
  0x49   :  { %v53_v17 = vadd.f32 %v52_v16, %v51_v14 }
  0x4b   :  { %v54_v18 = vrot.slane %v53_v17, 1 }
  0x4d   :  { %v55_v19 = vadd.f32 %v54_v18, %v53_v17 }
  0x4f   :  { %98 = vlog2.f32 %v55_v19 }
  0x59   :  { %v99_v22 = vpop.eup %98 }
  0x5a   :  { %v57_v24 = vmul.f32 0.6931472, %v99_v22 }
  0x5c   :  { %v58_v25 = vsub.f32 %v46_v8, %v57_v24 }
  0x5e   :  { %v65_v27 = vmul.f32 %v58_v25, %v37_v10 }
  0x60   :  { %v66_v28 = vsub.f32 %v64_v26, %v65_v27 }
  0x62   :  { %v67_v29 = vsel %vm38_vm0, %v66_v28, 0.0 }
  0x63   :  { %v68_v30 = vrot.slane %v67_v29, 4 }
  0x65   :  { %v69_v31 = vadd.f32 %v68_v30, %v67_v29 }
  0x67   :  { %v70_v32 = vrot.slane %v69_v31, 2 }
  0x69   :  { %v71_v33 = vadd.f32 %v70_v32, %v69_v31 }
  0x6b   :  { %v72_v34 = vrot.slane %v71_v33, 1 }
  0x6d   :  { %v73_v35 = vadd.f32 %v72_v34, %v71_v33 }
  0x6f   :  { %74 = vst [vmem:[#allocation7] sm:$0x1] %v73_v35 }
  0x70   :  { %155 = shalt.err (!%p152_p6)
}
  0x71   :  { %s156_s9 = scalar_lea.hbm %s233_s2, 16 }
  0x72   :  { %p157_p7 = scmp.ne.s32.totalorder %s233_s2, %s156_s9  ;;  %p160_p8 = scmp.lt.u32.totalorder %s156_s9, %s233_s2 }
  0x74   :  { %p162_p9 = pnand %p160_p8, %p157_p7 }
  0x76   :  { %165 = shalt.err (!%p162_p9)
}
  0x77   :  { %84 = dma.vmem_to_hbm [thread:$0]  %s82_s4, 16, %s233_s2, [#allocation4]  }
  0x78   :  { %170 = dma.done.wait [#allocation4], 16  }
  0x79   :  { %171 = vsyncadd [#allocation4], 4294967280 }
  0x7a   :  { %88 = vsyncpa [#allocation3], 1 }
  0x7b   :  { %89 = vsyncpa [#allocation6], 1 }
  0x7c   :  { %90 = vsyncpa [#allocation4], 1 }

</bundles_post_ra>
